<compile_context>
chip_gen: v6e
topology: v6e:2x2x1
jax: 0.10.0
libtpu: 0.0.40
codegen_flags: <defaults>
</compile_context>

<pallas_src>
import math
from functools import partial

import jax
import jax.numpy as jnp
from jax.experimental import pallas as pl
from jax.experimental.pallas import tpu as pltpu


def _softplus_beta(x, beta=10.0):
    # F.softplus(x, beta) = (1/beta) * log(1 + exp(beta * x)), numerically stable.
    return jax.nn.softplus(beta * x) / beta


def _round_up(x, m):
    return ((x + m - 1) // m) * m


def _cdiv(a, b):
    return -(-a // b)


def _nconv_kernel(w_ref, x_ref, halo_ref, inv_ref, o_ref, xc_ref, *, tap_shifts):
    """One lane-dense column tile: in-VMEM tap construction + MXU accumulate + f32 normalize.

    w_ref:    (KH*KW, Cout, Cin)  positive weights, one (Cout, Cin) block per tap (grid-invariant)
    x_ref:    (1, Cin, TM)        flat padded-image columns for this tile (compute dtype)
    halo_ref: (1, Cin, HALO)      the next HALO columns (max tap overhang, lane-aligned)
    inv_ref:  (Cout, TM)          1/(denom + eps), f32, shared across the batch
    o_ref:    (1, Cout, TM)       normalized conv output (lane-dense, transposed)
    xc_ref:   (Cin, TM + HALO)    VMEM scratch: tile ++ halo (aligned stores only)
    """
    tm = x_ref.shape[-1]
    # Assemble the tile + halo with two lane-aligned stores (TM, HALO are multiples of 128).
    xc_ref[:, :tm] = x_ref[0]
    xc_ref[:, tm:] = halo_ref[0]
    xc = xc_ref[...]                                              # (Cin, TM+HALO)

    # Tap (kh, kw) of the 'same' conv is a static lane shift kh*Wp + kw of the flat
    # padded image; accumulate KH*KW rank-Cin MXU updates in f32.
    acc = None
    for t, s in enumerate(tap_shifts):                            # static Python unroll
        tap = jnp.dot(w_ref[t], xc[:, s:s + tm],                  # (Cout,Cin) @ (Cin,TM)
                      preferred_element_type=jnp.float32)
        acc = tap if acc is None else acc + tap

    o_ref[0] = (acc * inv_ref[...]).astype(o_ref.dtype)           # exact f32 recip, no divide


def nconv_module_forward(x_nchw, weight_p, *, tile_m=1024, compute_dtype=None):
    """NconvModule.forward (generate_mode='matrix', bias=False, pos_fn='softplus').

    x_nchw:   (N, Cin, H, W)       float32
    weight_p: (Cout, Cin, KH, KW)  float32  (the 'weight_p' parameter stored by EnforcePos)
    returns:  (N, Cout, H, W)      x_nchw.dtype
    """
    N, Cin, H, W = x_nchw.shape
    Cout, Cin_w, KH, KW = weight_p.shape
    assert Cin_w == Cin
    # PyTorch applies padding = _pair(kernel_size[0]//2) to BOTH spatial dims; the 'same'
    # output shape assumed below therefore requires a square, odd kernel.
    if KH != KW or KH % 2 != 1:
        raise NotImplementedError("Pallas NconvModule port assumes a square, odd kernel.")
    pad = KH // 2
    eps = 1e-20
    out_dtype = x_nchw.dtype
    cdt = out_dtype if compute_dtype is None else compute_dtype

    Hp, Wp = H + 2 * pad, W + 2 * pad
    L = Hp * Wp                       # padded-width output columns per image

    # --- EnforcePos hook: effective weight = softplus(weight_p, beta=10) ---
    weight = _softplus_beta(weight_p, 10.0)                                 # (Cout,Cin,KH,KW) f32
    # One (Cout, Cin) weight block per tap, tap index = kh*KW + kw.
    w_taps = jnp.transpose(weight, (2, 3, 0, 1)).reshape(KH * KW, Cout, Cin).astype(cdt)

    # --- denom = conv2d(ones, weight): depends only on (cout, h, w); exact f32 reciprocal ---
    h_idx = jnp.arange(H)[:, None] + jnp.arange(KH)[None, :] - pad          # (H, KH)
    rmask = ((h_idx >= 0) & (h_idx < H)).astype(jnp.float32)
    w_idx = jnp.arange(W)[:, None] + jnp.arange(KW)[None, :] - pad          # (W, KW)
    cmask = ((w_idx >= 0) & (w_idx < W)).astype(jnp.float32)
    wsum = jnp.sum(weight, axis=1)                                          # (Cout, KH, KW)
    denom = jnp.einsum("ha,wb,oab->ohw", rmask, cmask, wsum)                # (Cout, H, W)
    inv_denom = 1.0 / (denom + eps)                                         # exact f32 recip

    # --- tile geometry -----------------------------------------------------------------
    # Max tap overhang past a column tile (flat padded-width coords), rounded to lanes.
    halo = _round_up((KH - 1) * Wp + (KW - 1), 128)
    # Lane-dense column tile, a multiple of `halo` so the halo view's block index is exact;
    # keep the total grid >= 2 so v7x's two TensorCores both get work.
    min_tiles = 2 if N == 1 else 1
    tm = max(halo, min(_round_up(tile_m, halo), _round_up(_cdiv(L, min_tiles), halo)))
    T = _cdiv(L, tm)                               # spatial tiles per image
    Limg = T * tm + halo                           # per-image flat length incl. halo tail

    # --- x: pad spatially once, flatten rows of the padded image (no KH*KW im2col copy) ---
    x_pad = jnp.pad(x_nchw.astype(cdt), ((0, 0), (0, 0), (pad, pad), (pad, pad)))
    x_flat = jnp.pad(x_pad.reshape(N, Cin, L), ((0, 0), (0, 0), (0, Limg - L)))   # (N,Cin,Limg)

    # --- 1/(denom+eps) on the padded-width column grid; NOT tiled across the batch ---
    inv_full = jnp.zeros((Cout, Hp, Wp), jnp.float32).at[:, :H, :W].set(inv_denom)
    inv_flat = jnp.pad(inv_full.reshape(Cout, L), ((0, 0), (0, T * tm - L)))       # (Cout, T*tm)

    tap_shifts = tuple(kh * Wp + kw for kh in range(KH) for kw in range(KW))
    kernel = partial(_nconv_kernel, tap_shifts=tap_shifts)

    out_flat = pl.pallas_call(
        kernel,
        out_shape=jax.ShapeDtypeStruct((N, Cout, T * tm), out_dtype),
        grid_spec=pltpu.PrefetchScalarGridSpec(
            num_scalar_prefetch=0,
            grid=(N, T),
            in_specs=[
                pl.BlockSpec((KH * KW, Cout, Cin), lambda n, m: (0, 0, 0)),   # weights (invariant)
                pl.BlockSpec((1, Cin, tm), lambda n, m: (n, 0, m)),           # column tile of x
                pl.BlockSpec((1, Cin, halo),                                  # tap-overhang halo
                             lambda n, m: (n, 0, (m + 1) * (tm // halo))),
                pl.BlockSpec((Cout, tm), lambda n, m: (0, m)),                # 1/(denom+eps), n-indep
            ],
            out_specs=pl.BlockSpec((1, Cout, tm), lambda n, m: (n, 0, m)),
            scratch_shapes=[pltpu.VMEM((Cin, tm + halo), cdt)],               # tile ++ halo
        ),
        compiler_params=pltpu.CompilerParams(
            dimension_semantics=("parallel", "parallel"),   # all steps independent (v7x: 2 TCs)
        ),
    )(w_taps, x_flat, x_flat, inv_flat)

    # Drop the dead padded-width columns; the result is already NCHW (no transpose needed).
    out = out_flat[:, :, :L].reshape(N, Cout, Hp, Wp)[:, :, :H, :W]
    return out


def _reference_forward(x_nchw, weight_p):
    """Pure-JAX reference (lax conv) of the same semantics, for a sanity check."""
    weight = _softplus_beta(weight_p, 10.0)
    conf = jnp.ones_like(x_nchw)
    pad = weight.shape[2] // 2
    dn = jax.lax.conv_dimension_numbers(x_nchw.shape, weight.shape, ("NCHW", "OIHW", "NCHW"))
    conv = lambda a: jax.lax.conv_general_dilated(
        a, weight, window_strides=(1, 1), padding=[(pad, pad), (pad, pad)],
        dimension_numbers=dn)
    denom = conv(conf)
    nomin = conv(x_nchw * conf)
    return nomin / (denom + 1e-20)


if __name__ == "__main__":
    # Module config: NconvModule(in_channels=4, out_channels=8, kernel_size=(3, 3))
    N, Cin, H, W = 2, 4, 16, 16
    Cout, KH, KW = 8, 3, 3

    key = jax.random.PRNGKey(0)
    kx, kw = jax.random.split(key)

    x = jax.random.normal(kx, (N, Cin, H, W), dtype=jnp.float32)

    # init_method='n': weight ~ Normal(mean=2, std=sqrt(2/(KH*KW*Cout)));
    # EnforcePos then stores weight_p = softplus(weight, beta=10) as the parameter.
    n_fan = KH * KW * Cout
    w0 = 2.0 + math.sqrt(2.0 / n_fan) * jax.random.normal(kw, (Cout, Cin, KH, KW), dtype=jnp.float32)
    weight_p = _softplus_beta(w0, 10.0)

    ref = _reference_forward(x, weight_p)

    # f32 path: exact module numerics.
    out = jax.block_until_ready(nconv_module_forward(x, weight_p))
    assert out.shape == (N, Cout, H, W)
    assert jnp.allclose(out, ref, atol=1e-4, rtol=1e-4)

    # bf16 activation/weight stream (f32 MXU accumulation + f32 normalize): halves the
    # dominant HBM stream; verified here against the f32 reference at a loose tolerance.
    out_bf16 = jax.block_until_ready(
        nconv_module_forward(x, weight_p, compute_dtype=jnp.bfloat16))
    assert jnp.allclose(out_bf16, ref, atol=2e-2, rtol=2e-2)

    # TODO(synk): the prop_conf confidence output (cout) is computed by NConv2d but discarded
    # by NconvModule.forward, so it is not produced here.
    print("KERNEL_OK")
</pallas_src>

<mosaic_0001>
module attributes {stable_mosaic.version = 11 : i64} {
  func.func @_nconv_kernel(%arg0: i32, %arg1: i32, %arg2: memref<9x8x4xf32, #tpu.memory_space<vmem>>, %arg3: memref<1x4x384xf32, #tpu.memory_space<vmem>>, %arg4: memref<1x4x128xf32, #tpu.memory_space<vmem>>, %arg5: memref<8x384xf32, #tpu.memory_space<vmem>>, %arg6: memref<1x8x384xf32, #tpu.memory_space<vmem>>, %arg7: memref<4x512xf32, #tpu.memory_space<vmem>>) attributes {dimension_semantics = [#tpu.dimension_semantics<parallel>, #tpu.dimension_semantics<parallel>], iteration_bounds = array<i64: 2, 1>, scalar_prefetch = 0 : i64, scratch_operands = 1 : i64, tpu.core_type = #tpu.core_type<tc>, window_params = [{pipeline_mode = #tpu.pipeline_mode<synchronous>, transform_indices = @transform_0, window_bounds = array<i64: 9, 8, 4>}, {transform_indices = @transform_1, window_bounds = array<i64: 1, 4, 384>}, {transform_indices = @transform_2, window_bounds = array<i64: 1, 4, 128>}, {transform_indices = @transform_3, window_bounds = array<i64: 8, 384>}, {transform_indices = @transform_4, window_bounds = array<i64: 1, 8, 384>}]} {
    %c0 = arith.constant 0 : index
    %c0_0 = arith.constant 0 : index
    %c0_1 = arith.constant 0 : index
    %0 = vector.load %arg3[%c0, %c0_0, %c0_1] : memref<1x4x384xf32, #tpu.memory_space<vmem>>, vector<1x4x384xf32>
    %1 = vector.shape_cast %0 : vector<1x4x384xf32> to vector<4x384xf32>
    %c0_2 = arith.constant 0 : index
    %c0_3 = arith.constant 0 : index
    %2 = vector.load %arg7[%c0_2, %c0_3] : memref<4x512xf32, #tpu.memory_space<vmem>>, vector<4x384xf32>
    tpu.vector_store %arg7[%c0_2, %c0_3], %1 {strides = array<i32>} : memref<4x512xf32, #tpu.memory_space<vmem>>, vector<4x384xf32>,
    %c0_4 = arith.constant 0 : index
    %c0_5 = arith.constant 0 : index
    %c0_6 = arith.constant 0 : index
    %3 = vector.load %arg4[%c0_4, %c0_5, %c0_6] : memref<1x4x128xf32, #tpu.memory_space<vmem>>, vector<1x4x128xf32>
    %4 = vector.shape_cast %3 : vector<1x4x128xf32> to vector<4x128xf32>
    %c0_7 = arith.constant 0 : index
    %c384 = arith.constant 384 : index
    %5 = vector.load %arg7[%c0_7, %c384] : memref<4x512xf32, #tpu.memory_space<vmem>>, vector<4x128xf32>
    tpu.vector_store %arg7[%c0_7, %c384], %4 {strides = array<i32>} : memref<4x512xf32, #tpu.memory_space<vmem>>, vector<4x128xf32>,
    %c0_8 = arith.constant 0 : index
    %c0_9 = arith.constant 0 : index
    %6 = vector.load %arg7[%c0_8, %c0_9] : memref<4x512xf32, #tpu.memory_space<vmem>>, vector<4x512xf32>
    %c0_10 = arith.constant 0 : index
    %c0_11 = arith.constant 0 : index
    %c0_12 = arith.constant 0 : index
    %7 = vector.load %arg2[%c0_10, %c0_11, %c0_12] : memref<9x8x4xf32, #tpu.memory_space<vmem>>, vector<1x8x4xf32>
    %8 = vector.shape_cast %7 : vector<1x8x4xf32> to vector<8x4xf32>
    %9 = vector.extract_strided_slice %6 {offsets = [0, 0], sizes = [4, 384], strides = [1, 1]} : vector<4x512xf32> to vector<4x384xf32>
    %cst = arith.constant dense<0.000000e+00> : vector<8x384xf32>
    %10 = tpu.matmul %8, %9, %cst {dimension_numbers = #tpu.dot_dimension_numbers<[1], [0], [0], [1], [0, 0, 1, 1], [], []>} : vector<8x4xf32>, vector<4x384xf32>, vector<8x384xf32> -> vector<8x384xf32>
    %c1 = arith.constant 1 : index
    %c0_13 = arith.constant 0 : index
    %c0_14 = arith.constant 0 : index
    %11 = vector.load %arg2[%c1, %c0_13, %c0_14] : memref<9x8x4xf32, #tpu.memory_space<vmem>>, vector<1x8x4xf32>
    %12 = vector.shape_cast %11 : vector<1x8x4xf32> to vector<8x4xf32>
    %13 = vector.extract_strided_slice %6 {offsets = [0, 1], sizes = [4, 384], strides = [1, 1]} : vector<4x512xf32> to vector<4x384xf32>
    %cst_15 = arith.constant dense<0.000000e+00> : vector<8x384xf32>
    %14 = tpu.matmul %12, %13, %cst_15 {dimension_numbers = #tpu.dot_dimension_numbers<[1], [0], [0], [1], [0, 0, 1, 1], [], []>} : vector<8x4xf32>, vector<4x384xf32>, vector<8x384xf32> -> vector<8x384xf32>
    %15 = arith.addf %10, %14 : vector<8x384xf32>
    %c2 = arith.constant 2 : index
    %c0_16 = arith.constant 0 : index
    %c0_17 = arith.constant 0 : index
    %16 = vector.load %arg2[%c2, %c0_16, %c0_17] : memref<9x8x4xf32, #tpu.memory_space<vmem>>, vector<1x8x4xf32>
    %17 = vector.shape_cast %16 : vector<1x8x4xf32> to vector<8x4xf32>
    %18 = vector.extract_strided_slice %6 {offsets = [0, 2], sizes = [4, 384], strides = [1, 1]} : vector<4x512xf32> to vector<4x384xf32>
    %cst_18 = arith.constant dense<0.000000e+00> : vector<8x384xf32>
    %19 = tpu.matmul %17, %18, %cst_18 {dimension_numbers = #tpu.dot_dimension_numbers<[1], [0], [0], [1], [0, 0, 1, 1], [], []>} : vector<8x4xf32>, vector<4x384xf32>, vector<8x384xf32> -> vector<8x384xf32>
    %20 = arith.addf %15, %19 : vector<8x384xf32>
    %c3 = arith.constant 3 : index
    %c0_19 = arith.constant 0 : index
    %c0_20 = arith.constant 0 : index
    %21 = vector.load %arg2[%c3, %c0_19, %c0_20] : memref<9x8x4xf32, #tpu.memory_space<vmem>>, vector<1x8x4xf32>
    %22 = vector.shape_cast %21 : vector<1x8x4xf32> to vector<8x4xf32>
    %23 = vector.extract_strided_slice %6 {offsets = [0, 18], sizes = [4, 384], strides = [1, 1]} : vector<4x512xf32> to vector<4x384xf32>
    %cst_21 = arith.constant dense<0.000000e+00> : vector<8x384xf32>
    %24 = tpu.matmul %22, %23, %cst_21 {dimension_numbers = #tpu.dot_dimension_numbers<[1], [0], [0], [1], [0, 0, 1, 1], [], []>} : vector<8x4xf32>, vector<4x384xf32>, vector<8x384xf32> -> vector<8x384xf32>
    %25 = arith.addf %20, %24 : vector<8x384xf32>
    %c4 = arith.constant 4 : index
    %c0_22 = arith.constant 0 : index
    %c0_23 = arith.constant 0 : index
    %26 = vector.load %arg2[%c4, %c0_22, %c0_23] : memref<9x8x4xf32, #tpu.memory_space<vmem>>, vector<1x8x4xf32>
    %27 = vector.shape_cast %26 : vector<1x8x4xf32> to vector<8x4xf32>
    %28 = vector.extract_strided_slice %6 {offsets = [0, 19], sizes = [4, 384], strides = [1, 1]} : vector<4x512xf32> to vector<4x384xf32>
    %cst_24 = arith.constant dense<0.000000e+00> : vector<8x384xf32>
    %29 = tpu.matmul %27, %28, %cst_24 {dimension_numbers = #tpu.dot_dimension_numbers<[1], [0], [0], [1], [0, 0, 1, 1], [], []>} : vector<8x4xf32>, vector<4x384xf32>, vector<8x384xf32> -> vector<8x384xf32>
    %30 = arith.addf %25, %29 : vector<8x384xf32>
    %c5 = arith.constant 5 : index
    %c0_25 = arith.constant 0 : index
    %c0_26 = arith.constant 0 : index
    %31 = vector.load %arg2[%c5, %c0_25, %c0_26] : memref<9x8x4xf32, #tpu.memory_space<vmem>>, vector<1x8x4xf32>
    %32 = vector.shape_cast %31 : vector<1x8x4xf32> to vector<8x4xf32>
    %33 = vector.extract_strided_slice %6 {offsets = [0, 20], sizes = [4, 384], strides = [1, 1]} : vector<4x512xf32> to vector<4x384xf32>
    %cst_27 = arith.constant dense<0.000000e+00> : vector<8x384xf32>
    %34 = tpu.matmul %32, %33, %cst_27 {dimension_numbers = #tpu.dot_dimension_numbers<[1], [0], [0], [1], [0, 0, 1, 1], [], []>} : vector<8x4xf32>, vector<4x384xf32>, vector<8x384xf32> -> vector<8x384xf32>
    %35 = arith.addf %30, %34 : vector<8x384xf32>
    %c6 = arith.constant 6 : index
    %c0_28 = arith.constant 0 : index
    %c0_29 = arith.constant 0 : index
    %36 = vector.load %arg2[%c6, %c0_28, %c0_29] : memref<9x8x4xf32, #tpu.memory_space<vmem>>, vector<1x8x4xf32>
    %37 = vector.shape_cast %36 : vector<1x8x4xf32> to vector<8x4xf32>
    %38 = vector.extract_strided_slice %6 {offsets = [0, 36], sizes = [4, 384], strides = [1, 1]} : vector<4x512xf32> to vector<4x384xf32>
    %cst_30 = arith.constant dense<0.000000e+00> : vector<8x384xf32>
    %39 = tpu.matmul %37, %38, %cst_30 {dimension_numbers = #tpu.dot_dimension_numbers<[1], [0], [0], [1], [0, 0, 1, 1], [], []>} : vector<8x4xf32>, vector<4x384xf32>, vector<8x384xf32> -> vector<8x384xf32>
    %40 = arith.addf %35, %39 : vector<8x384xf32>
    %c7 = arith.constant 7 : index
    %c0_31 = arith.constant 0 : index
    %c0_32 = arith.constant 0 : index
    %41 = vector.load %arg2[%c7, %c0_31, %c0_32] : memref<9x8x4xf32, #tpu.memory_space<vmem>>, vector<1x8x4xf32>
    %42 = vector.shape_cast %41 : vector<1x8x4xf32> to vector<8x4xf32>
    %43 = vector.extract_strided_slice %6 {offsets = [0, 37], sizes = [4, 384], strides = [1, 1]} : vector<4x512xf32> to vector<4x384xf32>
    %cst_33 = arith.constant dense<0.000000e+00> : vector<8x384xf32>
    %44 = tpu.matmul %42, %43, %cst_33 {dimension_numbers = #tpu.dot_dimension_numbers<[1], [0], [0], [1], [0, 0, 1, 1], [], []>} : vector<8x4xf32>, vector<4x384xf32>, vector<8x384xf32> -> vector<8x384xf32>
    %45 = arith.addf %40, %44 : vector<8x384xf32>
    %c8 = arith.constant 8 : index
    %c0_34 = arith.constant 0 : index
    %c0_35 = arith.constant 0 : index
    %46 = vector.load %arg2[%c8, %c0_34, %c0_35] : memref<9x8x4xf32, #tpu.memory_space<vmem>>, vector<1x8x4xf32>
    %47 = vector.shape_cast %46 : vector<1x8x4xf32> to vector<8x4xf32>
    %48 = vector.extract_strided_slice %6 {offsets = [0, 38], sizes = [4, 384], strides = [1, 1]} : vector<4x512xf32> to vector<4x384xf32>
    %cst_36 = arith.constant dense<0.000000e+00> : vector<8x384xf32>
    %49 = tpu.matmul %47, %48, %cst_36 {dimension_numbers = #tpu.dot_dimension_numbers<[1], [0], [0], [1], [0, 0, 1, 1], [], []>} : vector<8x4xf32>, vector<4x384xf32>, vector<8x384xf32> -> vector<8x384xf32>
    %50 = arith.addf %45, %49 : vector<8x384xf32>
    %c0_37 = arith.constant 0 : index
    %c0_38 = arith.constant 0 : index
    %51 = vector.load %arg5[%c0_37, %c0_38] : memref<8x384xf32, #tpu.memory_space<vmem>>, vector<8x384xf32>
    %52 = arith.mulf %50, %51 : vector<8x384xf32>
    %c0_39 = arith.constant 0 : index
    %c0_40 = arith.constant 0 : index
    %c0_41 = arith.constant 0 : index
    %53 = vector.load %arg6[%c0_39, %c0_40, %c0_41] : memref<1x8x384xf32, #tpu.memory_space<vmem>>, vector<1x8x384xf32>
    %54 = vector.shape_cast %53 : vector<1x8x384xf32> to vector<8x384xf32>
    %55 = vector.shape_cast %52 : vector<8x384xf32> to vector<1x8x384xf32>
    tpu.vector_store %arg6[%c0_39, %c0_40, %c0_41], %55 {strides = array<i32>} : memref<1x8x384xf32, #tpu.memory_space<vmem>>, vector<1x8x384xf32>,
    return
  }
  func.func @transform_0(%arg0: i32, %arg1: i32) -> (i32, i32, i32) {
    %c0_i32 = arith.constant 0 : i32
    %c0_i32_0 = arith.constant 0 : i32
    %c0_i32_1 = arith.constant 0 : i32
    %c0_i32_2 = arith.constant 0 : i32
    return %c0_i32, %c0_i32_0, %c0_i32_1 : i32, i32, i32
  }
  func.func @transform_1(%arg0: i32, %arg1: i32) -> (i32, i32, i32) {
    %c0_i32 = arith.constant 0 : i32
    %c0_i32_0 = arith.constant 0 : i32
    return %arg0, %c0_i32, %arg1 : i32, i32, i32
  }
  func.func @transform_2(%arg0: i32, %arg1: i32) -> (i32, i32, i32) {
    %c1_i32 = arith.constant 1 : i32
    %0 = arith.addi %arg1, %c1_i32 : i32
    %c3_i32 = arith.constant 3 : i32
    %1 = arith.muli %0, %c3_i32 : i32
    %c0_i32 = arith.constant 0 : i32
    %c0_i32_0 = arith.constant 0 : i32
    return %arg0, %c0_i32, %1 : i32, i32, i32
  }
  func.func @transform_3(%arg0: i32, %arg1: i32) -> (i32, i32) {
    %c0_i32 = arith.constant 0 : i32
    %c0_i32_0 = arith.constant 0 : i32
    return %c0_i32, %arg1 : i32, i32
  }
  func.func @transform_4(%arg0: i32, %arg1: i32) -> (i32, i32, i32) {
    %c0_i32 = arith.constant 0 : i32
    %c0_i32_0 = arith.constant 0 : i32
    return %arg0, %c0_i32, %arg1 : i32, i32, i32
  }
}

</mosaic_0001>

<bundles_post_ra>
// kernel: tpu_custom_call.1
= control target key start
LH: loop header
LB: loop body
LE: loop exit
PB: predicated region body
PF: predicated region fallthrough
CT: control target
= control target key end

     0   :  { %9 = vsyncpa [#allocation4], 0  ;;  %s2524_s0 = inlined_call_operand.vmem [shape: f32[9,8,4], index: 0, kind: input, shape index: {}]   ;;  %s2525_s1 = inlined_call_operand.vmem [shape: f32[2,4,512], index: 1, kind: input, shape index: {}]   ;;  %s2526_s2 = inlined_call_operand.vmem [shape: f32[2,4,512], index: 2, kind: input, shape index: {}]   ;;  %s2527_s3 = inlined_call_operand.vmem [shape: f32[8,384], index: 3, kind: input, shape index: {}]   ;;  %s2528_s4 = inlined_call_operand.hbm [shape: f32[2,8,384], index: 4, kind: output, shape index: {}]  }
   0x1   :  { %11 = vsyncpa [#allocation4 + $0x1], 0  ;;  %s2263_s15 = smov 0   ;;  %s2265_s16 = smov 0  }
   0x2   :  { %s2267_s17 = smov 0   ;;  %s2269_s18 = smov 0  }
   0x3   :  { %s2271_s19 = smov 0   ;;  %s2273_s20 = smov 0  }
   0x4 LB: > { %s1947_s21 = sadd.s32 4294967295, %s2225_s20   ;;  %s1948_s22 = sadd.s32 4294967294, %s2225_s20   ;;  %s2225_s20 = sphi %s2273_s20, %s17_s20   ;;  %s2221_s19 = sphi %s2271_s19, %s2535_s19   ;;  %s2217_s18 = sphi %s2269_s18, %s2534_s18   ;;  %s2213_s17 = sphi %s2267_s17, %s2533_s17   ;;  %s2209_s16 = sphi %s2265_s16, %s2532_s16   ;;  %s2205_s15 = sphi %s2263_s15, %s2531_s15  }
   0x5   : > { %s29_s23 = sadd.s32 1, %s2221_s19  ;;  %s145_s24 = sadd.s32 1, %s2213_s17 }
   0x6   : > { %p31_p0 = scmp.ge.s32.totalorder %s29_s23, 2  ;;  %p155_p1 = scmp.ne.s32.totalorder %s2213_s17, %s2209_s16 }
   0x7   : > { %p156_p2 = scmp.eq.s32.totalorder %s1947_s21, 1  ;;  %p161_p3 = scmp.ne.s32.totalorder %s2209_s16, %s2205_s15 }
   0x8   : > { %s2537_s23 = smov (%p31_p0, %s29_s23), 0  ;;  %p162_p5 = scmp.eq.s32.totalorder %s1948_s22, 1 }
   0x9   : > { %p2303_p4 = por %p156_p2, %p155_p1  ;;  %s140_s26 = ssub.s32 %s2221_s19, %s2537_s23 }
   0xa   : > { %p1952_p6 = scmp.ge.s32.totalorder %s2225_s20, 1  ;;  %p143_p7 = scmp.eq.s32.totalorder %s140_s26, 0 }
   0xb   : > { %p2310_p8 = por %p162_p5, %p161_p3  ;;  %p228_p9 = scmp.lt.s32.totalorder %s2225_s20, 3 }
   0xc   : > { %s2316_s28 = scalar_select %p143_p7, %s2213_s17, %s145_s24  }
   0xd   : > { %p229_p10 = pnand %p1952_p6, %p228_p9 }
   0xe   : > { %p282_p11 = scmp.lt.s32.totalorder (!%p229_p10), %s2217_s18, 1  ;;  %s2227_s12 = smov (!%p229_p10), 126  }
   0xf   : > { %232 = sbr.rel (%p229_p10) target bundleno = 419 (0x1a3), region = 36  ;;  %s2228_s13 = smov (!%p229_p10), 127  }
  0x10   : > { %s2231_s14 = smov (!%p229_p10), 110   ;;  %s2232_s21 = smov (!%p229_p10), 109  }
  0x11   : > { %s2233_s22 = smov (!%p229_p10), 108   ;;  %s2234_s24 = smov (!%p229_p10), 92  }
  0x12   : > { %s2235_s26 = smov (!%p229_p10), 91   ;;  %s274_s6 = sand.u32 (!%p229_p10), 1, %s2209_s16  }
  0x13   : > { %s2237_s5 = smov (!%p229_p10), [#allocation3]  }
  0x14   : > { %s283_s29 = scalar_select %p282_p11, %s2217_s18, 1  ;;  %v2229_v3 = vmov 0.0   ;;  %vm2230_vm0 = vmmov 0   ;;  %vm337_vm1 = vcmask 1039360   ;;  %vm345_vm2 = vcmask 1043456   ;;  %v1957_v15 = vld [vmem:[%s2524_s0 + $0x8] sm:$0xff] }
  0x15   : > { %416 = vmatprep.mubr.f32.mxu0 %v2229_v3  ;;  %2035 = vmatprep.subr.mxu1 %v2229_v3  ;;  %vm341_vm3 = vcmask 31744   ;;  %vm653_vm4 = vcmask 1031168   ;;  %v322_v20 = vld [vmem:[%s2524_s0] sm:$0xff]  ;;  %vm820_vm5 = vcmask 900096   ;;  %v1968_v26 = vld [vmem:[%s2524_s0 + $0x10] sm:$0xff]  ;;  %vm987_vm6 = vcmask 891904  }
  0x16   : > { %s2013_s30 = sshll.u32 %s283_s29, 4  ;;  %2037 = vmatprep.mubr.msk.f32.mxu1 %vm2230_vm0, %v2229_v3  ;;  %s2236_s29 = smov 90   ;;  %v1974_v31 = vld [vmem:[%s2524_s0 + $0x18] sm:$0xff]  ;;  %v1980_v37 = vld [vmem:[%s2524_s0 + $0x20] sm:$0xff]  ;;  %vm1154_vm7 = vcmask 883712   ;;  %v1986_v45 = vld [vmem:[%s2524_s0 + $0x28] sm:$0xff] }
  0x17   : > { %s289_s7 = scalar_lea.vmem %s2525_s1, %s2013_s30  ;;  %s2015_s8 = sadd.s32 12, %s2013_s30  ;;  %vm1321_vm8 = vcmask 752640   ;;  %v1992_v53 = vld [vmem:[%s2524_s0 + $0x30] sm:$0xff]  ;;  %vm1488_vm9 = vcmask 744448   ;;  %v1998_v61 = vld [vmem:[%s2524_s0 + $0x38] sm:$0xff]  ;;  %vm1655_vm10 = vcmask 736256  }
  0x18   : > { %v2323_v0 = vld [vmem:[%s289_s7] sm:$0xff]  ;;  %s304_s11 = scalar_lea.vmem %s2526_s2, %s2015_s8  ;;  %v315_v1 = vld [vmem:[%s289_s7 + $0x8] sm:$0xf]  ;;  %s2080_s7 = smul.u32 24, %s274_s6 }
  0x19   : > { %645 = vrot.lane.b32.xlu0 %v2323_v0, %s2227_s12  ;;  %329 = vrot.lane.b32.xlu1 %v2323_v0, %s2228_s13  ;;  %317 = vst [vmem:[#allocation2 + $0x8] sm:$0xf] %v315_v1  ;;  %v318_v2 = vld [vmem:[%s304_s11] sm:$0xf]  ;;  %v327_v5 = vcombine.high %v2323_v0, %v2323_v0 }
  0x1a   : > { %319 = vst [vmem:[#allocation2 + $0xc] sm:$0xf] %v318_v2 }
  0x21   : > { %v2334_v4 = vld [vmem:[#allocation2 + $0x8] sm:$0xff] }
  0x22   : > { %333 = vrot.lane.b32.xlu0 %v2334_v4, %s2228_s13  ;;  %649 = vrot.lane.b32.xlu1 %v2334_v4, %s2227_s12  ;;  %v328_v6 = vcombine.high %v2334_v4, %v2334_v4 }
  0x26   : > { %816 = vrot.lane.b32.xlu1 %v2334_v4, %s2231_s14  ;;  %331 = vrot.lane.b32.xlu0 %v327_v5, %s2228_s13 }
  0x2a   : > { %335 = vrot.lane.b32.xlu1 %v328_v6, %s2228_s13  ;;  %647 = vrot.lane.b32.xlu0 %v327_v5, %s2227_s12 }
  0x2e   : > { %651 = vrot.lane.b32.xlu1 %v328_v6, %s2227_s12  ;;  %814 = vrot.lane.b32.xlu0 %v327_v5, %s2231_s14  ;;  %s2081_s12 = smul.u32 384, %s2217_s18  ;;  %s1822_s18 = scalar_lea.sflag [#allocation4], %s274_s6 }
  0x32   : > { %818 = vrot.lane.b32.xlu1 %v328_v6, %s2231_s14  ;;  %812 = vrot.lane.b32.xlu0 %v2323_v0, %s2231_s14 }
  0x36   : > { %983 = vrot.lane.b32.xlu1 %v2334_v4, %s2232_s21  ;;  %981 = vrot.lane.b32.xlu0 %v327_v5, %s2232_s21 }
  0x3a   : > { %985 = vrot.lane.b32.xlu1 %v328_v6, %s2232_s21  ;;  %979 = vrot.lane.b32.xlu0 %v2323_v0, %s2232_s21  ;;  %s276_s21 = scalar_lea.vmem [#allocation3], %s2080_s7  ;;  %s2153_s7 = sshll.u32 %s2237_s5, 4  ;;  %s2154_s7 = int_to_ptr.vmem [resolvable:$false] %s2153_s7 }
  0x3b   : > { %s2155_s8 = scalar_lea.vmem %s2154_s7, 768 }
  0x3e   : > { %1150 = vrot.lane.b32.xlu1 %v2334_v4, %s2233_s22  ;;  %1148 = vrot.lane.b32.xlu0 %v327_v5, %s2233_s22 }
  0x42   : > { %1152 = vrot.lane.b32.xlu1 %v328_v6, %s2233_s22  ;;  %1146 = vrot.lane.b32.xlu0 %v2323_v0, %s2233_s22  ;;  %s1838_s22 = sshll.u32 %s276_s21, 4  ;;  %s1839_s22 = int_to_ptr.vmem [resolvable:$true] %s1838_s22 }
  0x43   : > { %s2149_s30 = scalar_lea.vmem %s1839_s22, 384  ;;  %p2156_p1 = scmp.lt.s32.totalorder %s1839_s22, %s2154_s7 }
  0x44   : > { %p2150_p12 = scmp.ne.s32.totalorder %s1839_s22, %s2149_s30  ;;  %p2157_p2 = scmp.lt.s32.totalorder %s2155_s8, %s2149_s30 }
  0x46   : > { %1317 = vrot.lane.b32.xlu1 %v2334_v4, %s2234_s24  ;;  %1315 = vrot.lane.b32.xlu0 %v327_v5, %s2234_s24  ;;  %p2151_p13 = pnand %p2150_p12, %p2303_p4  ;;  %p2158_p3 = por %p2157_p2, %p2156_p1 }
  0x48   : > { %p2152_p0 = pneg %p2151_p13 }
  0x4a   : > { %1319 = vrot.lane.b32.xlu1 %v328_v6, %s2234_s24  ;;  %1313 = vrot.lane.b32.xlu0 %v2323_v0, %s2234_s24  ;;  %p2159_p5 = pnand %p2158_p3, %p2152_p0 }
  0x4e   : > { %1484 = vrot.lane.b32.xlu1 %v2334_v4, %s2235_s26  ;;  %1482 = vrot.lane.b32.xlu0 %v327_v5, %s2235_s26 }
  0x52   : > { %1486 = vrot.lane.b32.xlu1 %v328_v6, %s2235_s26  ;;  %1480 = vrot.lane.b32.xlu0 %v2323_v0, %s2235_s26 }
  0x56   : > { %1651 = vrot.lane.b32.xlu1 %v2334_v4, %s2236_s29  ;;  %1649 = vrot.lane.b32.xlu0 %v327_v5, %s2236_s29 }
  0x5a   : > { %1653 = vrot.lane.b32.xlu1 %v328_v6, %s2236_s29  ;;  %1647 = vrot.lane.b32.xlu0 %v2323_v0, %s2236_s29  ;;  %v2004_v6 = vld [vmem:[%s2524_s0 + $0x40] sm:$0xff]  ;;  %s1836_s29 = scalar_lea.hbm %s2528_s4, %s2081_s12 }
  0x8b   : > { %v646_v7 = vpop.permute.xlu0 %645  ;;  %v330_v8 = vpop.permute.xlu1 %329 }
  0x94   : > { %v334_v9 = vpop.permute.xlu0 %333  ;;  %v650_v10 = vpop.permute.xlu1 %649 }
  0x98   : > { %v817_v11 = vpop.permute.xlu1 %816  ;;  %v332_v12 = vpop.permute.xlu0 %331 }
  0x99   : > { %v339_v13 = vsel %vm337_vm1, %v332_v12, %v334_v9  ;;  %v338_v14 = vsel %vm337_vm1, %v330_v8, %v332_v12 }
  0x9a   : > { %1958 = vmatprep.subr.msk.mxu0 %vm345_vm2, %v339_v13 }
  0x9b   : > { %1959 = vmatpush1.msk.msra.mxu0 %vm345_vm2, %v338_v14 }
  0x9c   : > { %v336_v16 = vpop.permute.xlu1 %335  ;;  %1960 = vmatmul.mubr.msk.f32.vlgmr.msra.gmra.mxu0 %vm341_vm3, %v1957_v15  ;;  %1963 = vmatprep.subr.msk.mxu0 %vm345_vm2, %v327_v5  ;;  %v648_v17 = vpop.permute.xlu0 %647 }
  0x9d   : > { %v655_v18 = vsel %vm653_vm4, %v648_v17, %v650_v10  ;;  %1964 = vmatpush1.msk.msra.mxu0 %vm345_vm2, %v2323_v0  ;;  %v340_v19 = vsel %vm337_vm1, %v334_v9, %v336_v16  ;;  %566 = vmatprep.mubr.f32.mxu0 %v2229_v3  ;;  %v654_v21 = vsel %vm653_vm4, %v646_v7, %v648_v17 }
  0x9e   : > { %2036 = vmatpush3.msk.msra.mxu1 %vm345_vm2, %v340_v19  ;;  %1969 = vmatprep.subr.msk.mxu0 %vm345_vm2, %v655_v18 }
  0x9f   : > { %2038 = vmatmul.mubr.msk.f32.vlgmr.msra.gmra.mxu1 %vm341_vm3, %v1957_v15  ;;  %2040 = vmatprep.subr.mxu1 %v2229_v3 }
  0xa0   : > { %v652_v22 = vpop.permute.xlu1 %651  ;;  %1965 = vmatmul.mubr.msk.f32.vlgmr.msra.gmra.mxu0 %vm341_vm3, %v322_v20  ;;  %v815_v23 = vpop.permute.xlu0 %814  ;;  %2041 = vmatpush3.msk.msra.mxu1 %vm345_vm2, %v2334_v4 }
  0xa1   : > { %v656_v24 = vsel %vm653_vm4, %v650_v10, %v652_v22  ;;  %1970 = vmatpush1.msk.msra.mxu0 %vm345_vm2, %v654_v21  ;;  %v822_v25 = vsel %vm820_vm5, %v815_v23, %v817_v11  ;;  %2042 = vmatprep.mubr.msk.f32.mxu1 %vm2230_vm0, %v2229_v3 }
  0xa2   : > { %2045 = vmatprep.subr.mxu1 %v2229_v3  ;;  %1975 = vmatprep.subr.msk.mxu0 %vm345_vm2, %v822_v25 }
  0xa3   : > { %2043 = vmatmul.mubr.msk.f32.vlgmr.msra.gmra.mxu1 %vm341_vm3, %v322_v20  ;;  %730 = vmatprep.mubr.f32.mxu0 %v2229_v3 }
  0xa4   : > { %2046 = vmatpush3.msk.msra.mxu1 %vm345_vm2, %v656_v24  ;;  %v819_v27 = vpop.permute.xlu1 %818  ;;  %v813_v28 = vpop.permute.xlu0 %812  ;;  %1971 = vmatmul.mubr.msk.f32.vlgmr.msra.gmra.mxu0 %vm341_vm3, %v1968_v26 }
  0xa5   : > { %v823_v29 = vsel %vm820_vm5, %v817_v11, %v819_v27  ;;  %v821_v30 = vsel %vm820_vm5, %v813_v28, %v815_v23  ;;  %2047 = vmatprep.mubr.msk.f32.mxu1 %vm2230_vm0, %v2229_v3  ;;  %2050 = vmatprep.subr.mxu1 %v2229_v3 }
  0xa6   : > { %1976 = vmatpush1.msk.msra.mxu0 %vm345_vm2, %v821_v30  ;;  %897 = vmatprep.mubr.f32.mxu0 %v2229_v3 }
  0xa7   : > { %2048 = vmatmul.mubr.msk.f32.vlgmr.msra.gmra.mxu1 %vm341_vm3, %v1968_v26 }
  0xa8   : > { %2051 = vmatpush3.msk.msra.mxu1 %vm345_vm2, %v823_v29  ;;  %v984_v32 = vpop.permute.xlu1 %983  ;;  %v982_v33 = vpop.permute.xlu0 %981  ;;  %2052 = vmatprep.mubr.msk.f32.mxu1 %vm2230_vm0, %v2229_v3 }
  0xa9   : > { %v989_v34 = vsel %vm987_vm6, %v982_v33, %v984_v32  ;;  %2055 = vmatprep.subr.mxu1 %v2229_v3  ;;  %1977 = vmatmul.mubr.msk.f32.vlgmr.msra.gmra.mxu0 %vm341_vm3, %v1974_v31 }
  0xaa   : > { %1981 = vmatprep.subr.msk.mxu0 %vm345_vm2, %v989_v34  ;;  %1064 = vmatprep.mubr.f32.mxu0 %v2229_v3 }
  0xab   : > { %2053 = vmatmul.mubr.msk.f32.vlgmr.msra.gmra.mxu1 %vm341_vm3, %v1974_v31 }
  0xac   : > { %v986_v35 = vpop.permute.xlu1 %985  ;;  %v980_v36 = vpop.permute.xlu0 %979  ;;  %2057 = vmatprep.mubr.msk.f32.mxu1 %vm2230_vm0, %v2229_v3 }
  0xad   : > { %v990_v38 = vsel %vm987_vm6, %v984_v32, %v986_v35  ;;  %v988_v39 = vsel %vm987_vm6, %v980_v36, %v982_v33 }
  0xae   : > { %1982 = vmatpush1.msk.msra.mxu0 %vm345_vm2, %v988_v39  ;;  %2056 = vmatpush3.msk.msra.mxu1 %vm345_vm2, %v990_v38 }
  0xaf   : > { %1983 = vmatmul.mubr.msk.f32.vlgmr.msra.gmra.mxu0 %vm341_vm3, %v1980_v37  ;;  %2060 = vmatprep.subr.mxu1 %v2229_v3 }
  0xb0   : > { %v1151_v40 = vpop.permute.xlu1 %1150  ;;  %v1149_v41 = vpop.permute.xlu0 %1148  ;;  %2058 = vmatmul.mubr.msk.f32.vlgmr.msra.gmra.mxu1 %vm341_vm3, %v1980_v37  ;;  %1231 = vmatprep.mubr.f32.mxu0 %v2229_v3 }
  0xb1   : > { %v1156_v42 = vsel %vm1154_vm7, %v1149_v41, %v1151_v40  ;;  %2062 = vmatprep.mubr.msk.f32.mxu1 %vm2230_vm0, %v2229_v3 }
  0xb2   : > { %1987 = vmatprep.subr.msk.mxu0 %vm345_vm2, %v1156_v42 }
  0xb4   : > { %v1153_v43 = vpop.permute.xlu1 %1152  ;;  %v1147_v44 = vpop.permute.xlu0 %1146 }
  0xb5   : > { %v1157_v46 = vsel %vm1154_vm7, %v1151_v40, %v1153_v43  ;;  %v1155_v47 = vsel %vm1154_vm7, %v1147_v44, %v1149_v41 }
  0xb6   : > { %1988 = vmatpush1.msk.msra.mxu0 %vm345_vm2, %v1155_v47  ;;  %2061 = vmatpush3.msk.msra.mxu1 %vm345_vm2, %v1157_v46 }
  0xb7   : > { %1989 = vmatmul.mubr.msk.f32.vlgmr.msra.gmra.mxu0 %vm341_vm3, %v1986_v45  ;;  %2063 = vmatmul.mubr.msk.f32.vlgmr.msra.gmra.mxu1 %vm341_vm3, %v1986_v45 }
  0xb8   : > { %v1318_v48 = vpop.permute.xlu1 %1317  ;;  %v1316_v49 = vpop.permute.xlu0 %1315  ;;  %2065 = vmatprep.subr.mxu1 %v2229_v3  ;;  %1398 = vmatprep.mubr.f32.mxu0 %v2229_v3 }
  0xb9   : > { %v1323_v50 = vsel %vm1321_vm8, %v1316_v49, %v1318_v48  ;;  %2067 = vmatprep.mubr.msk.f32.mxu1 %vm2230_vm0, %v2229_v3 }
  0xba   : > { %1993 = vmatprep.subr.msk.mxu0 %vm345_vm2, %v1323_v50 }
  0xbc   : > { %v1320_v51 = vpop.permute.xlu1 %1319  ;;  %v1314_v52 = vpop.permute.xlu0 %1313 }
  0xbd   : > { %v1324_v54 = vsel %vm1321_vm8, %v1318_v48, %v1320_v51  ;;  %v1322_v55 = vsel %vm1321_vm8, %v1314_v52, %v1316_v49 }
  0xbe   : > { %1994 = vmatpush1.msk.msra.mxu0 %vm345_vm2, %v1322_v55  ;;  %2066 = vmatpush3.msk.msra.mxu1 %vm345_vm2, %v1324_v54 }
  0xbf   : > { %1995 = vmatmul.mubr.msk.f32.vlgmr.msra.gmra.mxu0 %vm341_vm3, %v1992_v53  ;;  %2068 = vmatmul.mubr.msk.f32.vlgmr.msra.gmra.mxu1 %vm341_vm3, %v1992_v53 }
  0xc0   : > { %v1485_v56 = vpop.permute.xlu1 %1484  ;;  %v1483_v57 = vpop.permute.xlu0 %1482  ;;  %2070 = vmatprep.subr.mxu1 %v2229_v3  ;;  %1565 = vmatprep.mubr.f32.mxu0 %v2229_v3 }
  0xc1   : > { %v1490_v58 = vsel %vm1488_vm9, %v1483_v57, %v1485_v56  ;;  %2072 = vmatprep.mubr.msk.f32.mxu1 %vm2230_vm0, %v2229_v3 }
  0xc2   : > { %1999 = vmatprep.subr.msk.mxu0 %vm345_vm2, %v1490_v58 }
  0xc4   : > { %v1487_v59 = vpop.permute.xlu1 %1486  ;;  %v1481_v60 = vpop.permute.xlu0 %1480 }
  0xc5   : > { %v1491_v62 = vsel %vm1488_vm9, %v1485_v56, %v1487_v59  ;;  %v1489_v63 = vsel %vm1488_vm9, %v1481_v60, %v1483_v57 }
  0xc6   : > { %2000 = vmatpush1.msk.msra.mxu0 %vm345_vm2, %v1489_v63  ;;  %2071 = vmatpush3.msk.msra.mxu1 %vm345_vm2, %v1491_v62  ;;  %v1814_v63 = vld [vmem:[%s2527_s3 + $0x10] sm:$0xff] }
  0xc7   : > { %2001 = vmatmul.mubr.msk.f32.vlgmr.msra.gmra.mxu0 %vm341_vm3, %v1998_v61  ;;  %2073 = vmatmul.mubr.msk.f32.vlgmr.msra.gmra.mxu1 %vm341_vm3, %v1998_v61  ;;  %v1812_v61 = vld [vmem:[%s2527_s3] sm:$0xff] }
  0xc8   : > { %v1652_v0 = vpop.permute.xlu1 %1651  ;;  %v1650_v1 = vpop.permute.xlu0 %1649  ;;  %2075 = vmatprep.subr.mxu1 %v2229_v3  ;;  %1732 = vmatprep.mubr.f32.mxu0 %v2229_v3 }
  0xc9   : > { %v1657_v2 = vsel %vm1655_vm10, %v1650_v1, %v1652_v0  ;;  %2077 = vmatprep.mubr.msk.f32.mxu1 %vm2230_vm0, %v2229_v3 }
  0xca   : > { %2005 = vmatprep.subr.msk.mxu0 %vm345_vm2, %v1657_v2 }
  0xcc   : > { %v1654_v4 = vpop.permute.xlu1 %1653  ;;  %v1648_v5 = vpop.permute.xlu0 %1647 }
  0xcd   : > { %v1658_v7 = vsel %vm1655_vm10, %v1652_v0, %v1654_v4  ;;  %v1656_v8 = vsel %vm1655_vm10, %v1648_v5, %v1650_v1  ;;  %v1813_v5 = vld [vmem:[%s2527_s3 + $0x8] sm:$0xff] }
  0xce   : > { %2006 = vmatpush1.msk.msra.mxu0 %vm345_vm2, %v1656_v8  ;;  %2076 = vmatpush3.msk.msra.mxu1 %vm345_vm2, %v1658_v7 }
  0xcf   : > { %2007 = vmatmul.mubr.msk.f32.vlgmr.msra.gmra.mxu0 %vm341_vm3, %v2004_v6  ;;  %2078 = vmatmul.mubr.msk.f32.vlgmr.msra.gmra.mxu1 %vm341_vm3, %v2004_v6 }
 0x15c   : > { %v418_v9 = vpop.f32.mrf.mxu0 }
 0x15e   : > { %v420_v3 = vpop.f32.mrf.mxu0 }
 0x15f   : > { %v489_v10 = vpop.f32.mrf.mxu1 }
 0x160   : > { %v568_v11 = vpop.f32.mrf.mxu0 }
 0x161   : > { %v2039_v12 = vpop.f32.mrf.mxu1  ;;  %v569_v30 = vadd.f32 %v568_v11, %v418_v9 }
 0x162   : > { %v570_v13 = vpop.f32.mrf.mxu0 }
 0x163   : > { %v639_v14 = vpop.f32.mrf.mxu1  ;;  %v571_v33 = vadd.f32 %v570_v13, %v420_v3 }
 0x164   : > { %v732_v15 = vpop.f32.mrf.mxu0  ;;  %v640_v31 = vadd.f32 %v639_v14, %v489_v10 }
 0x165   : > { %v2044_v16 = vpop.f32.mrf.mxu1  ;;  %v807_v34 = vadd.f32 %v732_v15, %v569_v30 }
 0x166   : > { %v734_v18 = vpop.f32.mrf.mxu0 }
 0x167   : > { %v803_v17 = vpop.f32.mrf.mxu1  ;;  %v808_v39 = vadd.f32 %v734_v18, %v571_v33 }
 0x168   : > { %v809_v35 = vadd.f32 %v803_v17, %v640_v31 }
 0x169   : > { %v2049_v19 = vpop.f32.mrf.mxu1  ;;  %v899_v21 = vpop.f32.mrf.mxu0 }
 0x16a   : > { %v974_v40 = vadd.f32 %v899_v21, %v807_v34 }
 0x16b   : > { %v970_v20 = vpop.f32.mrf.mxu1  ;;  %v901_v24 = vpop.f32.mrf.mxu0 }
 0x16c   : > { %v976_v41 = vadd.f32 %v970_v20, %v809_v35  ;;  %v975_v43 = vadd.f32 %v901_v24, %v808_v39 }
 0x16d   : > { %v2054_v22 = vpop.f32.mrf.mxu1 }
 0x16f   : > { %v1066_v26 = vpop.f32.mrf.mxu0 }
 0x170   : > { %v1137_v23 = vpop.f32.mrf.mxu1  ;;  %v1141_v44 = vadd.f32 %v1066_v26, %v974_v40 }
 0x171   : > { %v1068_v28 = vpop.f32.mrf.mxu0  ;;  %v1143_v45 = vadd.f32 %v1137_v23, %v976_v41 }
 0x172   : > { %v2059_v25 = vpop.f32.mrf.mxu1  ;;  %v1142_v50 = vadd.f32 %v1068_v28, %v975_v43 }
 0x177   : > { %v1304_v27 = vpop.f32.mrf.mxu1  ;;  %v1233_v32 = vpop.f32.mrf.mxu0 }
 0x178   : > { %v1308_v51 = vadd.f32 %v1233_v32, %v1141_v44  ;;  %v1310_v52 = vadd.f32 %v1304_v27, %v1143_v45 }
 0x179   : > { %v2064_v29 = vpop.f32.mrf.mxu1  ;;  %v1235_v37 = vpop.f32.mrf.mxu0 }
 0x17a   : > { %v1309_v53 = vadd.f32 %v1235_v37, %v1142_v50 }
 0x17f   : > { %v1471_v36 = vpop.f32.mrf.mxu1  ;;  %v1400_v42 = vpop.f32.mrf.mxu0 }
 0x180   : > { %v1475_v54 = vadd.f32 %v1400_v42, %v1308_v51  ;;  %v1477_v55 = vadd.f32 %v1471_v36, %v1310_v52 }
 0x181   : > { %v2069_v38 = vpop.f32.mrf.mxu1  ;;  %v1402_v46 = vpop.f32.mrf.mxu0 }
 0x182   : > { %v1476_v57 = vadd.f32 %v1402_v46, %v1309_v53 }
 0x187   : > { %v1638_v47 = vpop.f32.mrf.mxu1  ;;  %v1567_v48 = vpop.f32.mrf.mxu0 }
 0x188   : > { %v1642_v58 = vadd.f32 %v1567_v48, %v1475_v54  ;;  %v1644_v59 = vadd.f32 %v1638_v47, %v1477_v55 }
 0x189   : > { %v2074_v49 = vpop.f32.mrf.mxu1  ;;  %v1569_v56 = vpop.f32.mrf.mxu0 }
 0x18a   : > { %v1643_v0 = vadd.f32 %v1569_v56, %v1476_v57 }
 0x18f   : > { %v1734_v60 = vpop.f32.mrf.mxu0  ;;  %v1805_v62 = vpop.f32.mrf.mxu1 }
 0x190   : > { %v1809_v1 = vadd.f32 %v1734_v60, %v1642_v58  ;;  %v1811_v2 = vadd.f32 %v1805_v62, %v1644_v59 }
 0x191   : > { %v1736_v4 = vpop.f32.mrf.mxu0  ;;  %v2079_v6 = vpop.f32.mrf.mxu1 }
 0x192   : > { %v1815_v7 = vmul.f32 %v1812_v61, %v1809_v1  ;;  %v1817_v8 = vmul.f32 %v1814_v63, %v1811_v2  ;;  %v1810_v9 = vadd.f32 %v1736_v4, %v1643_v0 }
 0x194   : > { %1818 = vst [vmem:[%s276_s21] sm:$0xff] %v1815_v7  ;;  %1820 = vst [vmem:[%s276_s21 + $0x10] sm:$0xff] %v1817_v8  ;;  %v1816_v3 = vmul.f32 %v1813_v5, %v1810_v9 }
 0x196   : > { %1819 = vst [vmem:[%s276_s21 + $0x8] sm:$0xff] %v1816_v3 }
 0x197   : > { %2162 = shalt.err (!%p2159_p5)
}
 0x198   : > { %s2163_s9 = scalar_lea.hbm %s1836_s29, 384  ;;  %s2167_s11 = scalar_lea.hbm %s2528_s4, 768 }
 0x199   : > { %p2164_p6 = scmp.ne.s32.totalorder %s1836_s29, %s2163_s9  ;;  %p2168_p10 = scmp.lt.s32.totalorder %s1836_s29, %s2528_s4 }
 0x19a   : > { %p2169_p11 = scmp.lt.s32.totalorder %s2167_s11, %s2163_s9 }
 0x19b   : > { %p2165_p7 = pnand %p2164_p6, %p2303_p4 }
 0x19c   : > { %p2170_p12 = por %p2169_p11, %p2168_p10 }
 0x19d   : > { %p2166_p9 = pneg %p2165_p7 }
 0x19f   : > { %p2171_p13 = pnand %p2170_p12, %p2166_p9 }
 0x1a1   : > { %2174 = shalt.err (!%p2171_p13)
}
 0x1a2   : > { %2082 = dma.vmem_to_hbm [thread:$0]  (%p2303_p4), %s1839_s22, 384, %s1836_s29, %s1822_s18  }
 0x1a3 PF: > { %p2088_p0 = scmp.ge.s32.totalorder %s2225_s20, 2  ;;  %s1850_s14 = sand.u32 1, %s2205_s15  }
 0x1a4   : > { %s1851_s21 = scalar_lea.sflag [#allocation4], %s1850_s14 }
 0x1a5   : > { %p2085_p1 = pnand %p2088_p0, %p2310_p8 }
 0x1a7   : > { %p2086_p2 = pneg %p2085_p1 }
 0x1a9   : > { %2200 = dma.done.wait (%p2086_p2), %s1851_s21, 384  }
 0x1aa   : > { %2202 = vsyncadd (%p2086_p2), %s1851_s21, 4294966912  ;;  %s17_s20 = sadd.s32 1, %s2225_s20   ;;  %s2531_s15 = smov %s2209_s16 }
 0x1ab   : > { %p14_p3 = scmp.ge.s32.totalorder %s17_s20, 4   ;;  %s2532_s16 = smov %s2213_s17 }
 0x1ac   : > { %s2533_s17 = smov %s2316_s28  ;;  %s2534_s18 = smov %s2221_s19 }
 0x1ad   : > { %s2535_s19 = smov %s2537_s23  ;;  %16 = sbr.rel (!%p14_p3) target bundleno = 4 (0x4), region = 85 }
 0x1b2   :  { %1856 = vsyncpa [#allocation4], 1 }
 0x1b3   :  { %1858 = vsyncpa [#allocation4 + $0x1], 1 }

</bundles_post_ra>
